<compile_context>
chip_gen: v7x
topology: tpu7x:2x2x1
jax: 0.10.0
libtpu: 0.0.40
codegen_flags: <defaults>
</compile_context>

<pallas_src>
import functools

import jax
import jax.numpy as jnp
from jax.experimental import pallas as pl
from jax.experimental.pallas import tpu as pltpu


def _round_up(n, m):
    return ((n + m - 1) // m) * m


def _cdiv(a, b):
    return -(-a // b)


@functools.lru_cache(maxsize=1)
def _tpu_vmem_bytes():
    """Per-TensorCore VMEM capacity; conservative 64 MiB (v7x-sized) fallback."""
    try:
        info = pltpu.get_tpu_info()
        cap = int(getattr(info, "vmem_capacity_bytes", 0))
        if cap > 0:
            return cap
    except Exception:
        pass
    return 64 << 20


# ---------------------------------------------------------------------------
# Kernels
# ---------------------------------------------------------------------------
def _mlp_kernel(x_ref, w1_ref, b1_ref, w2_ref, b2_ref, o_ref):
    """Whole-H kernel: one batch tile per grid step, weights resident."""
    x = x_ref[...]                                       # [bb, H] native dtype

    # Linear 1 on the MXU, f32 accumulation.
    h = jnp.dot(x, w1_ref[...], preferred_element_type=jnp.float32)
    h = h + b1_ref[...].astype(jnp.float32)

    # LeakyReLU(negative_slope=0.2) on the VPU.
    h = jnp.where(h > 0, h, 0.2 * h)

    # Width-1 Linear 2 as VPU multiply + lane reduction (w2 is a (1, Hh) row).
    w2 = w2_ref[...].astype(jnp.float32)
    y = jnp.sum(h * w2, axis=-1, keepdims=True)          # [bb, 1]

    # Scalar output bias lives in SMEM.
    y = y + b2_ref[0]
    o_ref[...] = y.astype(o_ref.dtype)


def _mlp_kernel_ktiled(x_ref, w1_ref, b1_ref, w2_ref, b2_ref, o_ref, acc_ref):
    """K-tiled kernel: used when W1 alone would blow the VMEM weight budget."""
    k = pl.program_id(1)

    @pl.when(k == 0)
    def _init():
        acc_ref[...] = jnp.zeros_like(acc_ref)

    acc_ref[...] += jnp.dot(x_ref[...], w1_ref[...],
                            preferred_element_type=jnp.float32)

    @pl.when(k == pl.num_programs(1) - 1)
    def _finalize():
        h = acc_ref[...] + b1_ref[...].astype(jnp.float32)
        h = jnp.where(h > 0, h, 0.2 * h)
        w2 = w2_ref[...].astype(jnp.float32)
        y = jnp.sum(h * w2, axis=-1, keepdims=True)
        o_ref[...] = (y + b2_ref[0]).astype(o_ref.dtype)


def _weight_spec(block_shape, index_map, single_buffer):
    """Constant-index weight BlockSpec, optionally single-buffered."""
    if single_buffer:
        try:
            return pl.BlockSpec(block_shape, index_map,
                                pipeline_mode=pl.Buffered(1))
        except (TypeError, ValueError):
            pass  # older/newer API: fall back to the default double buffer
    return pl.BlockSpec(block_shape, index_map)


# ---------------------------------------------------------------------------
# Wrapper
# ---------------------------------------------------------------------------
@functools.partial(jax.jit,
                   static_argnames=("target_tile_bytes", "max_weight_bytes"))
def cpm_discriminator_fwd(x, w1, b1, w2, b2, *,
                          target_tile_bytes=2 << 20,
                          max_weight_bytes=None):
    """Forward pass of CpmDiscriminator.

    x:  [B, H]
    w1: [H, H//2]          b1: [H//2] (or [1, H//2])
    w2: [H//2, 1] (or [H//2]), y = x @ W + b orientation
    b2: [1] (or scalar)
    returns [B, 1] in x.dtype

    target_tile_bytes: desired x-tile DMA size per grid step (static).
    max_weight_bytes:  test/override knob for the resident-weight budget.
    """
    B, H = x.shape
    Hh = w1.shape[1]
    assert w1.shape == (H, Hh), w1.shape

    # Cast weights to the activation dtype: bf16 activations + f32 weights
    # would silently promote the MXU pass to f32 and double W1's DMA/VMEM.
    wdt = x.dtype
    w1 = jnp.asarray(w1).astype(wdt)
    b1_row = jnp.asarray(b1).reshape(1, Hh).astype(wdt)
    w2_row = jnp.asarray(w2).reshape(1, Hh).astype(wdt)      # row for VPU reduce
    b2_s = jnp.asarray(b2).reshape(1).astype(jnp.float32)    # scalar -> SMEM

    isz = x.dtype.itemsize

    # ---- per-generation VMEM budget (trace-time Python) -------------------
    phys = _tpu_vmem_bytes()              # 64 MiB on v7x, 128 MiB on v5e/v6e
    budget = (phys * 3) // 4              # headroom for compiler scratch
    weight_budget = (budget // 2 if max_weight_bytes is None
                     else int(max_weight_bytes))

    w1_bytes = H * Hh * isz
    small_w_bytes = 2 * Hh * isz          # b1 row + w2 row

    use_ktile = False
    single_buffer_w = False
    resident_w = 2 * (w1_bytes + small_w_bytes)
    if 2 * (w1_bytes + small_w_bytes) <= weight_budget and 2 * w1_bytes <= (8 << 20):
        pass                                               # small weights: default
    elif (w1_bytes + small_w_bytes) <= weight_budget:
        single_buffer_w = True                             # free VMEM for x tiles
        resident_w = w1_bytes + small_w_bytes
    elif H % 128 == 0:
        use_ktile = True                                   # stream W1 over H
    else:
        # Weights exceed the budget and H cannot be K-tiled cleanly:
        # single-buffer and let vmem_limit track the true working set.
        single_buffer_w = True
        resident_w = w1_bytes + small_w_bytes

    B8 = _round_up(B, 8)

    if not use_ktile:
        # ----------------- whole-H path ------------------------------------
        row_bytes = H * isz
        # x dbl-buf + out dbl-buf + f32 intermediate h + f32 y, per batch row.
        per_row = 2 * H * isz + 2 * isz + Hh * 4 + 4
        avail = max(budget - resident_w, 8 * per_row)
        rows_budget = max(8, (avail // per_row) // 8 * 8)

        if B8 <= rows_budget and B8 * row_bytes <= 4 * target_tile_bytes:
            bb = B8          # tiny problem: one un-pipelined step is cheapest
        else:
            target_rows = _round_up(_cdiv(target_tile_bytes, row_bytes), 8)
            bb = max(8, min(target_rows, rows_budget, B8))
            # Keep a few grid steps for DMA/compute overlap and v7x megacore
            # sharding, as long as each x DMA stays >= ~1 MiB.
            steps = _cdiv(B8, bb)
            if 1 < steps < 8:
                bb_alt = max(8, _round_up(_cdiv(B8, 8), 8))
                if bb_alt * row_bytes >= (1 << 20) and bb_alt <= rows_budget:
                    bb = bb_alt

        Bp = _round_up(B, bb)
        xp = jnp.pad(x, ((0, Bp - B), (0, 0))) if Bp != B else x
        grid = (Bp // bb,)

        need = resident_w + bb * per_row
        vmem_limit = int(min(phys, max(32 << 20, need + max(need // 4, 8 << 20))))

        cost = pl.CostEstimate(
            flops=2 * Bp * H * Hh + 4 * Bp * Hh,
            transcendentals=0,
            bytes_accessed=Bp * H * isz + (H * Hh + 2 * Hh) * isz + Bp * isz + 4,
        )

        out = pl.pallas_call(
            _mlp_kernel,
            out_shape=jax.ShapeDtypeStruct((Bp, 1), x.dtype),
            grid_spec=pltpu.PrefetchScalarGridSpec(
                num_scalar_prefetch=0,
                grid=grid,
                in_specs=[
                    pl.BlockSpec((bb, H), lambda i: (i, 0)),            # x tile
                    _weight_spec((H, Hh), lambda i: (0, 0), single_buffer_w),
                    _weight_spec((1, Hh), lambda i: (0, 0), single_buffer_w),
                    _weight_spec((1, Hh), lambda i: (0, 0), single_buffer_w),
                    pl.BlockSpec(memory_space=pltpu.MemorySpace.SMEM),  # b2
                ],
                out_specs=pl.BlockSpec((bb, 1), lambda i: (i, 0)),
            ),
            compiler_params=pltpu.CompilerParams(
                dimension_semantics=("parallel",),
                vmem_limit_bytes=vmem_limit,
            ),
            cost_estimate=cost,
        )(xp, w1, b1_row, w2_row, b2_s)

        return out[:B]

    # --------------------- K-tiled path (huge W1) ---------------------------
    # Pick tk: largest multiple of 128 dividing H whose double-buffered W1
    # k-tile fits the weight budget (floor at 128).
    tk_budget = max(weight_budget // 2, 2 * 128 * Hh * isz)
    tk = 128
    for cand in range(128, H + 1, 128):
        if H % cand == 0 and 2 * cand * Hh * isz <= tk_budget:
            tk = cand
    nk = H // tk

    resident_w = 2 * tk * Hh * isz + 2 * small_w_bytes
    per_row = 2 * tk * isz + 2 * isz + Hh * 4 + 4       # x k-tile dbl-buf + out + f32 acc
    avail = max(budget - resident_w, 8 * per_row)
    rows_budget = max(8, (avail // per_row) // 8 * 8)
    target_rows = _round_up(_cdiv(target_tile_bytes, tk * isz), 8)
    bb = max(8, min(target_rows, rows_budget, B8))

    Bp = _round_up(B, bb)
    xp = jnp.pad(x, ((0, Bp - B), (0, 0))) if Bp != B else x
    grid = (Bp // bb, nk)                                # reduction axis last

    need = resident_w + bb * per_row
    vmem_limit = int(min(phys, max(32 << 20, need + max(need // 4, 8 << 20))))

    cost = pl.CostEstimate(
        flops=2 * Bp * H * Hh + 4 * Bp * Hh,
        transcendentals=0,
        bytes_accessed=Bp * H * isz + (H * Hh + 2 * Hh) * isz + Bp * isz + 4,
    )

    out = pl.pallas_call(
        _mlp_kernel_ktiled,
        out_shape=jax.ShapeDtypeStruct((Bp, 1), x.dtype),
        grid_spec=pltpu.PrefetchScalarGridSpec(
            num_scalar_prefetch=0,
            grid=grid,
            in_specs=[
                pl.BlockSpec((bb, tk), lambda i, k: (i, k)),    # x (b, k) tile
                pl.BlockSpec((tk, Hh), lambda i, k: (k, 0)),    # W1 k-tile
                pl.BlockSpec((1, Hh), lambda i, k: (0, 0)),     # b1
                pl.BlockSpec((1, Hh), lambda i, k: (0, 0)),     # w2 row
                pl.BlockSpec(memory_space=pltpu.MemorySpace.SMEM),  # b2
            ],
            out_specs=pl.BlockSpec((bb, 1), lambda i, k: (i, 0)),
            scratch_shapes=[pltpu.VMEM((bb, Hh), jnp.float32)],
        ),
        compiler_params=pltpu.CompilerParams(
            dimension_semantics=("parallel", "arbitrary"),
            vmem_limit_bytes=vmem_limit,
        ),
        cost_estimate=cost,
    )(xp, w1, b1_row, w2_row, b2_s)

    return out[:B]


# ---------------------------------------------------------------------------
# Reference & init (mirror nn.Linear defaults)
# ---------------------------------------------------------------------------
def init_params(key, hidden):
    """nn.Linear default U(-1/sqrt(fan_in), 1/sqrt(fan_in)) init."""
    h2 = hidden // 2
    k1, k2, k3, k4 = jax.random.split(key, 4)
    lim1 = 1.0 / float(hidden) ** 0.5
    lim2 = 1.0 / float(h2) ** 0.5
    w1 = jax.random.uniform(k1, (hidden, h2), jnp.float32, -lim1, lim1)
    b1 = jax.random.uniform(k2, (h2,), jnp.float32, -lim1, lim1)
    w2 = jax.random.uniform(k3, (h2, 1), jnp.float32, -lim2, lim2)
    b2 = jax.random.uniform(k4, (1,), jnp.float32, -lim2, lim2)
    return w1, b1, w2, b2


def reference(x, w1, b1, w2, b2):
    h = x @ w1 + b1.reshape(1, -1)
    h = jnp.where(h > 0, h, 0.2 * h)
    return h @ w2.reshape(-1, 1) + b2.reshape(1, 1)


if __name__ == "__main__":
    key = jax.random.PRNGKey(0)
    kx, kp, kx2, kx3, kp2 = jax.random.split(key, 5)

    # layer_size[1] = hidden = 32 (small shapes per the module spec).
    H = 32
    B = 256
    x = jax.random.normal(kx, (B, H), jnp.float32)
    w1, b1, w2, b2 = init_params(kp, H)

    # 1) Default path (small problem -> single un-pipelined step).
    out = jax.block_until_ready(cpm_discriminator_fwd(x, w1, b1, w2, b2))
    ref = reference(x, w1, b1, w2, b2)
    assert out.shape == (B, 1), out.shape
    assert jnp.allclose(out, ref, atol=1e-5, rtol=1e-5), float(
        jnp.max(jnp.abs(out - ref)))

    # 2) Ragged / tiny batch (pad + slice path).
    x2 = jax.random.normal(kx2, (6, H), jnp.float32)
    out2 = jax.block_until_ready(cpm_discriminator_fwd(x2, w1, b1, w2, b2))
    ref2 = reference(x2, w1, b1, w2, b2)
    assert out2.shape == (6, 1), out2.shape
    assert jnp.allclose(out2, ref2, atol=1e-5, rtol=1e-5), float(
        jnp.max(jnp.abs(out2 - ref2)))

    # 3) Force a multi-step, pipelined batch grid (exercise double-buffering).
    out3 = jax.block_until_ready(
        cpm_discriminator_fwd(x, w1, b1, w2, b2, target_tile_bytes=4 << 10))
    assert jnp.allclose(out3, ref, atol=1e-5, rtol=1e-5), float(
        jnp.max(jnp.abs(out3 - ref)))

    # 4) Exercise the K-tiled fallback (as if W1 blew the VMEM weight budget).
    H2 = 256
    x4 = jax.random.normal(kx3, (64, H2), jnp.float32)
    w1b, b1b, w2b, b2b = init_params(kp2, H2)
    out4 = jax.block_until_ready(
        cpm_discriminator_fwd(x4, w1b, b1b, w2b, b2b, max_weight_bytes=16 << 10))
    ref4 = reference(x4, w1b, b1b, w2b, b2b)
    assert out4.shape == (64, 1), out4.shape
    assert jnp.allclose(out4, ref4, atol=1e-4, rtol=1e-4), float(
        jnp.max(jnp.abs(out4 - ref4)))

    # 5) bf16 activations: weights are cast to bf16 in the wrapper (MXU bf16 path).
    xb = x.astype(jnp.bfloat16)
    outb = jax.block_until_ready(cpm_discriminator_fwd(xb, w1, b1, w2, b2))
    refb = reference(xb.astype(jnp.float32), w1, b1, w2, b2)
    assert outb.shape == (B, 1) and outb.dtype == jnp.bfloat16
    assert jnp.allclose(outb.astype(jnp.float32), refb, atol=0.2, rtol=0.1), float(
        jnp.max(jnp.abs(outb.astype(jnp.float32) - refb)))

    print("KERNEL_OK")
</pallas_src>

<mosaic_0001>
module attributes {stable_mosaic.version = 11 : i64} {
  func.func @_mlp_kernel(%arg0: i32, %arg1: memref<256x32xf32, #tpu.memory_space<vmem>>, %arg2: memref<32x16xf32, #tpu.memory_space<vmem>>, %arg3: memref<1x16xf32, #tpu.memory_space<vmem>>, %arg4: memref<1x16xf32, #tpu.memory_space<vmem>>, %arg5: memref<1xf32, #tpu.memory_space<smem>>, %arg6: memref<256x1xf32, #tpu.memory_space<vmem>>) attributes {dimension_semantics = [#tpu.dimension_semantics<parallel>], iteration_bounds = array<i64: 1>, scalar_prefetch = 0 : i64, scratch_operands = 0 : i64, tpu.core_type = #tpu.core_type<tc>, window_params = [{transform_indices = @transform_0, window_bounds = array<i64: 256, 32>}, {pipeline_mode = #tpu.pipeline_mode<synchronous>, transform_indices = @transform_1, window_bounds = array<i64: 32, 16>}, {pipeline_mode = #tpu.pipeline_mode<synchronous>, transform_indices = @transform_2, window_bounds = array<i64: 1, 16>}, {pipeline_mode = #tpu.pipeline_mode<synchronous>, transform_indices = @transform_3, window_bounds = array<i64: 1, 16>}, {transform_indices = @transform_4, window_bounds = array<i64: 1>}, {transform_indices = @transform_5, window_bounds = array<i64: 256, 1>}]} {
    %c0 = arith.constant 0 : index
    %c0_0 = arith.constant 0 : index
    %0 = vector.load %arg1[%c0, %c0_0] : memref<256x32xf32, #tpu.memory_space<vmem>>, vector<256x32xf32>
    %c0_1 = arith.constant 0 : index
    %c0_2 = arith.constant 0 : index
    %1 = vector.load %arg2[%c0_1, %c0_2] : memref<32x16xf32, #tpu.memory_space<vmem>>, vector<32x16xf32>
    %cst = arith.constant dense<0.000000e+00> : vector<256x16xf32>
    %2 = tpu.matmul %0, %1, %cst {dimension_numbers = #tpu.dot_dimension_numbers<[1], [0], [0], [1], [0, 0, 1, 1], [], []>} : vector<256x32xf32>, vector<32x16xf32>, vector<256x16xf32> -> vector<256x16xf32>
    %c0_3 = arith.constant 0 : index
    %c0_4 = arith.constant 0 : index
    %3 = vector.load %arg3[%c0_3, %c0_4] : memref<1x16xf32, #tpu.memory_space<vmem>>, vector<1x16xf32>
    %4 = vector.broadcast %3 : vector<1x16xf32> to vector<256x16xf32>
    %5 = arith.addf %2, %4 : vector<256x16xf32>
    %cst_5 = arith.constant 0.000000e+00 : f32
    %6 = vector.broadcast %cst_5 : f32 to vector<256x16xf32>
    %7 = arith.cmpf ogt, %5, %6 : vector<256x16xf32>
    %cst_6 = arith.constant 2.000000e-01 : f32
    %8 = vector.broadcast %cst_6 : f32 to vector<256x16xf32>
    %9 = arith.mulf %8, %5 : vector<256x16xf32>
    %10 = arith.select %7, %5, %9 : vector<256x16xi1>, vector<256x16xf32>
    %c0_7 = arith.constant 0 : index
    %c0_8 = arith.constant 0 : index
    %11 = vector.load %arg4[%c0_7, %c0_8] : memref<1x16xf32, #tpu.memory_space<vmem>>, vector<1x16xf32>
    %12 = vector.broadcast %11 : vector<1x16xf32> to vector<256x16xf32>
    %13 = arith.mulf %10, %12 : vector<256x16xf32>
    %cst_9 = arith.constant dense<0.000000e+00> : vector<256xf32>
    %14 = vector.multi_reduction <add>, %13, %cst_9 [1] : vector<256x16xf32> to vector<256xf32>
    %15 = vector.shape_cast %14 : vector<256xf32> to vector<256x1xf32>
    %c0_10 = arith.constant 0 : index
    %16 = memref.load %arg5[%c0_10] : memref<1xf32, #tpu.memory_space<smem>>
    %17 = vector.broadcast %16 : f32 to vector<256x1xf32>
    %18 = arith.addf %15, %17 : vector<256x1xf32>
    %c0_11 = arith.constant 0 : index
    %c0_12 = arith.constant 0 : index
    %19 = vector.load %arg6[%c0_11, %c0_12] : memref<256x1xf32, #tpu.memory_space<vmem>>, vector<256x1xf32>
    tpu.vector_store %arg6[%c0_11, %c0_12], %18 {strides = array<i32>} : memref<256x1xf32, #tpu.memory_space<vmem>>, vector<256x1xf32>,
    return
  }
  func.func @transform_0(%arg0: i32) -> (i32, i32) {
    %c0_i32 = arith.constant 0 : i32
    %c0_i32_0 = arith.constant 0 : i32
    return %arg0, %c0_i32 : i32, i32
  }
  func.func @transform_1(%arg0: i32) -> (i32, i32) {
    %c0_i32 = arith.constant 0 : i32
    %c0_i32_0 = arith.constant 0 : i32
    %c0_i32_1 = arith.constant 0 : i32
    return %c0_i32, %c0_i32_0 : i32, i32
  }
  func.func @transform_2(%arg0: i32) -> (i32, i32) {
    %c0_i32 = arith.constant 0 : i32
    %c0_i32_0 = arith.constant 0 : i32
    %c0_i32_1 = arith.constant 0 : i32
    return %c0_i32, %c0_i32_0 : i32, i32
  }
  func.func @transform_3(%arg0: i32) -> (i32, i32) {
    %c0_i32 = arith.constant 0 : i32
    %c0_i32_0 = arith.constant 0 : i32
    %c0_i32_1 = arith.constant 0 : i32
    return %c0_i32, %c0_i32_0 : i32, i32
  }
  func.func @transform_4(%arg0: i32) -> i32 {
    %c0_i32 = arith.constant 0 : i32
    %c0_i32_0 = arith.constant 0 : i32
    return %c0_i32 : i32
  }
  func.func @transform_5(%arg0: i32) -> (i32, i32) {
    %c0_i32 = arith.constant 0 : i32
    %c0_i32_0 = arith.constant 0 : i32
    return %arg0, %c0_i32 : i32, i32
  }
}

</mosaic_0001>

<bundles_post_ra>
// kernel: cpm_discriminator_fwd.1
= control target key start
LH: loop header
LB: loop body
LE: loop exit
PB: predicated region body
PF: predicated region fallthrough
CT: control target
= control target key end

     0   :  { %vm64_vm0 = vcmask 261120   ;;  %vm521_vm4 = vcmask 130048   ;;  %s1309_s1 = inlined_call_operand.vmem [shape: f32[32,16], index: 1, kind: input, shape index: {}]   ;;  %s1310_s0 = inlined_call_operand.vmem [shape: f32[256,32], index: 0, kind: input, shape index: {}]   ;;  %s1311_s2 = inlined_call_operand.vmem [shape: f32[1,16], index: 2, kind: input, shape index: {}]   ;;  %s1312_s3 = inlined_call_operand.vmem [shape: f32[1,16], index: 3, kind: input, shape index: {}]   ;;  %s1313_s4 = inlined_call_operand.<no memory space> [shape: f32[1], index: 4, kind: input, shape index: {}]   ;;  %s1314_s5 = inlined_call_operand.vmem [shape: f32[256,1], index: 5, kind: output, shape index: {}]  }
   0x1   :  { %v53_v0 = vld [vmem:[%s1309_s1] sm:$0xff]  ;;  %v54_v1 = vld [vmem:[%s1309_s1 + $0x8] sm:$0xff]  ;;  %v55_v2 = vld [vmem:[%s1309_s1 + $0x10] sm:$0xff] }
   0x2   :  { %v815_v3 = vpack.c.bf16 %v54_v1, %v53_v0  ;;  %v56_v4 = vld [vmem:[%s1309_s1 + $0x18] sm:$0xff]  ;;  %v21_v5 = vld [vmem:[%s1310_s0] sm:$0xff]  ;;  %v22_v8 = vld [vmem:[%s1310_s0 + $0x8] sm:$0xff] }
   0x3   :  { %v37_v6 = vld [vmem:[%s1310_s0 + $0x80] sm:$0xff]  ;;  %v819_v7 = vpack.c.bf16 %v56_v4, %v55_v2  ;;  %767 = vmatprep.mubr.msk.f32.mxu0 %vm64_vm0, %v21_v5  ;;  %v38_v9 = vld [vmem:[%s1310_s0 + $0x88] sm:$0xff]  ;;  %v23_v10 = vld [vmem:[%s1310_s0 + $0x10] sm:$0xff] }
   0x4   :  { %791 = vmatprep.mubr.msk.f32.mxu1 %vm64_vm0, %v37_v6  ;;  %816 = vmatprep.subr.bf16.mxu0 %v815_v3  ;;  %v39_v11 = vld [vmem:[%s1310_s0 + $0x90] sm:$0xff]  ;;  %v24_v12 = vld [vmem:[%s1310_s0 + $0x18] sm:$0xff]  ;;  %v25_v14 = vld [vmem:[%s1310_s0 + $0x20] sm:$0xff] }
   0x5   :  { %823 = vmatprep.subr.bf16.mxu1 %v815_v3  ;;  %818 = vmatpush3.bf16.msra.mxu0 %v815_v3  ;;  %v40_v13 = vld [vmem:[%s1310_s0 + $0x98] sm:$0xff]  ;;  %v41_v15 = vld [vmem:[%s1310_s0 + $0xa0] sm:$0xff]  ;;  %v26_v16 = vld [vmem:[%s1310_s0 + $0x28] sm:$0xff] }
   0x6   :  { %825 = vmatpush3.bf16.msra.mxu1 %v815_v3  ;;  %820 = vmatprep.subr.bf16.mxu0 %v819_v7  ;;  %v42_v17 = vld [vmem:[%s1310_s0 + $0xa8] sm:$0xff]  ;;  %v27_v18 = vld [vmem:[%s1310_s0 + $0x30] sm:$0xff]  ;;  %v28_v20 = vld [vmem:[%s1310_s0 + $0x38] sm:$0xff] }
   0x7   :  { %824 = vmatprep.subr.bf16.mxu1 %v819_v7  ;;  %v43_v19 = vld [vmem:[%s1310_s0 + $0xb0] sm:$0xff]  ;;  %v44_v21 = vld [vmem:[%s1310_s0 + $0xb8] sm:$0xff]  ;;  %v29_v22 = vld [vmem:[%s1310_s0 + $0x40] sm:$0xff] }
   0x8   :  { %v45_v23 = vld [vmem:[%s1310_s0 + $0xc0] sm:$0xff]  ;;  %v30_v24 = vld [vmem:[%s1310_s0 + $0x48] sm:$0xff]  ;;  %v31_v26 = vld [vmem:[%s1310_s0 + $0x50] sm:$0xff] }
   0x9   :  { %822 = vmatpush3.bf16.msra.mxu0 %v819_v7  ;;  %v46_v25 = vld [vmem:[%s1310_s0 + $0xc8] sm:$0xff]  ;;  %v47_v27 = vld [vmem:[%s1310_s0 + $0xd0] sm:$0xff]  ;;  %v32_v28 = vld [vmem:[%s1310_s0 + $0x58] sm:$0xff] }
   0xa   :  { %826 = vmatpush3.bf16.msra.mxu1 %v819_v7  ;;  %v48_v29 = vld [vmem:[%s1310_s0 + $0xd8] sm:$0xff]  ;;  %v33_v30 = vld [vmem:[%s1310_s0 + $0x60] sm:$0xff]  ;;  %v34_v32 = vld [vmem:[%s1310_s0 + $0x68] sm:$0xff] }
   0xb   :  { %v49_v31 = vld [vmem:[%s1310_s0 + $0xe0] sm:$0xff]  ;;  %v50_v33 = vld [vmem:[%s1310_s0 + $0xe8] sm:$0xff]  ;;  %v35_v34 = vld [vmem:[%s1310_s0 + $0x70] sm:$0xff] }
   0xc   :  { %768 = vmatmul.mubr.msk.f32.vlgmr.msra.gmra.mrb[0].mxu0 %vm64_vm0, %v22_v8  ;;  %v51_v35 = vld [vmem:[%s1310_s0 + $0xf0] sm:$0xff]  ;;  %v36_v36 = vld [vmem:[%s1310_s0 + $0x78] sm:$0xff]  ;;  %v1000_v38 = vld [vmem:[%s1311_s2] ss:$0 sm:$0xff] }
   0xd   :  { %792 = vmatmul.mubr.msk.f32.vlgmr.msra.gmra.mrb[0].mxu1 %vm64_vm0, %v38_v9  ;;  %770 = vmatprep.mubr.msk.f32.mxu0 %vm64_vm0, %v23_v10  ;;  %v52_v37 = vld [vmem:[%s1310_s0 + $0xf8] sm:$0xff]  ;;  %v1009_v47 = vld [vmem:[%s1312_s3] ss:$0 sm:$0xff] }
   0xe   :  { %794 = vmatprep.mubr.msk.f32.mxu1 %vm64_vm0, %v39_v11 }
  0x10   :  { %771 = vmatmul.mubr.msk.f32.gmra.mrb[2].mxu0 %vm64_vm0, %v24_v12 }
  0x11   :  { %795 = vmatmul.mubr.msk.f32.gmra.mrb[2].mxu1 %vm64_vm0, %v40_v13  ;;  %773 = vmatprep.mubr.msk.f32.mxu0 %vm64_vm0, %v25_v14 }
  0x12   :  { %797 = vmatprep.mubr.msk.f32.mxu1 %vm64_vm0, %v41_v15 }
  0x14   :  { %774 = vmatmul.mubr.msk.f32.gmra.mrb[4].mxu0 %vm64_vm0, %v26_v16 }
  0x15   :  { %798 = vmatmul.mubr.msk.f32.gmra.mrb[4].mxu1 %vm64_vm0, %v42_v17  ;;  %776 = vmatprep.mubr.msk.f32.mxu0 %vm64_vm0, %v27_v18 }
  0x16   :  { %800 = vmatprep.mubr.msk.f32.mxu1 %vm64_vm0, %v43_v19 }
  0x18   :  { %777 = vmatmul.mubr.msk.f32.gmra.mrb[6].mxu0 %vm64_vm0, %v28_v20 }
  0x19   :  { %801 = vmatmul.mubr.msk.f32.gmra.mrb[6].mxu1 %vm64_vm0, %v44_v21  ;;  %779 = vmatprep.mubr.msk.f32.mxu0 %vm64_vm0, %v29_v22 }
  0x1a   :  { %803 = vmatprep.mubr.msk.f32.mxu1 %vm64_vm0, %v45_v23 }
  0x1c   :  { %780 = vmatmul.mubr.msk.f32.gmra.mrb[8].mxu0 %vm64_vm0, %v30_v24 }
  0x1d   :  { %804 = vmatmul.mubr.msk.f32.gmra.mrb[8].mxu1 %vm64_vm0, %v46_v25  ;;  %782 = vmatprep.mubr.msk.f32.mxu0 %vm64_vm0, %v31_v26 }
  0x1e   :  { %806 = vmatprep.mubr.msk.f32.mxu1 %vm64_vm0, %v47_v27 }
  0x20   :  { %783 = vmatmul.mubr.msk.f32.gmra.mrb[10].mxu0 %vm64_vm0, %v32_v28 }
  0x21   :  { %807 = vmatmul.mubr.msk.f32.gmra.mrb[10].mxu1 %vm64_vm0, %v48_v29  ;;  %785 = vmatprep.mubr.msk.f32.mxu0 %vm64_vm0, %v33_v30 }
  0x22   :  { %809 = vmatprep.mubr.msk.f32.mxu1 %vm64_vm0, %v49_v31 }
  0x24   :  { %786 = vmatmul.mubr.msk.f32.gmra.mrb[12].mxu0 %vm64_vm0, %v34_v32 }
  0x25   :  { %810 = vmatmul.mubr.msk.f32.gmra.mrb[12].mxu1 %vm64_vm0, %v50_v33  ;;  %788 = vmatprep.mubr.msk.f32.mxu0 %vm64_vm0, %v35_v34 }
  0x26   :  { %812 = vmatprep.mubr.msk.f32.mxu1 %vm64_vm0, %v51_v35 }
  0x28   :  { %789 = vmatmul.mubr.msk.f32.gmra.mrb[14].mxu0 %vm64_vm0, %v36_v36 }
  0x29   :  { %813 = vmatmul.mubr.msk.f32.gmra.mrb[14].mxu1 %vm64_vm0, %v52_v37 }
  0xdf   :  { %v769_v39 = vpop.f32.mrb[0].mxu0 }
  0xe0   :  { %v793_v40 = vpop.f32.mrb[0].mxu1  ;;  %v233_v41 = vadd.f32 %v769_v39, %v1000_v38  ;;  %v227_v43 = vpop.f32.mrb[1].mxu0 }
  0xe1   :  { %v313_v42 = vadd.f32 %v793_v40, %v1000_v38  ;;  %v307_v44 = vpop.f32.mrb[1].mxu1  ;;  %v228_v45 = vadd.f32 %v1000_v38, %v227_v43 }
  0xe2   :  { %v308_v46 = vadd.f32 %v1000_v38, %v307_v44  ;;  %v419_v48 = vmul.f32 0.2, %v233_v41  ;;  %vm387_vm2 = vcmp.gt.f32.partialorder %v233_v41, 0.0 }
  0xe3   :  { %v435_v49 = vmul.f32 0.2, %v313_v42  ;;  %vm403_vm1 = vcmp.gt.f32.partialorder %v313_v42, 0.0  ;;  %vm386_vm3 = vcmp.gt.f32.partialorder %v228_v45, 0.0  ;;  %v418_v50 = vmul.f32 0.2, %v228_v45 }
  0xe4   :  { %v772_v51 = vpop.f32.mrb[2].mxu0  ;;  %v796_v52 = vpop.f32.mrb[2].mxu1  ;;  %v451_v54 = vsel %vm387_vm2, %v233_v41, %v419_v48  ;;  %vm402_vm5 = vcmp.gt.f32.partialorder %v308_v46, 0.0  ;;  %v434_v61 = vmul.f32 0.2, %v308_v46 }
  0xe5   :  { %v467_v53 = vsel %vm403_vm1, %v313_v42, %v435_v49  ;;  %v243_v55 = vadd.f32 %v772_v51, %v1000_v38  ;;  %v237_v56 = vpop.f32.mrb[3].mxu0  ;;  %v323_v57 = vadd.f32 %v796_v52, %v1000_v38  ;;  %v317_v58 = vpop.f32.mrb[3].mxu1  ;;  %v490_v60 = vmul.f32 %v1009_v47, %v451_v54 }
  0xe6   :  { %v506_v59 = vmul.f32 %v1009_v47, %v467_v53  ;;  %v238_v62 = vadd.f32 %v1000_v38, %v237_v56  ;;  %v450_v63 = vsel %vm386_vm3, %v228_v45, %v418_v50  ;;  %v318_v2 = vadd.f32 %v1000_v38, %v317_v58 }
  0xe7   :  { %vm389_vm6 = vcmp.gt.f32.partialorder %v243_v55, 0.0  ;;  %v421_v0 = vmul.f32 0.2, %v243_v55  ;;  %v437_v1 = vmul.f32 0.2, %v323_v57  ;;  %vm405_vm7 = vcmp.gt.f32.partialorder %v323_v57, 0.0 }
  0xe8   :  { %v573_v3 = vsel %vm521_vm4, %v506_v59, 0.0  ;;  %v525_v4 = vsel %vm521_vm4, %v490_v60, 0.0  ;;  %v775_v5 = vpop.f32.mrb[4].mxu0  ;;  %v489_v7 = vmul.f32 %v1009_v47, %v450_v63  ;;  %v799_v8 = vpop.f32.mrb[4].mxu1  ;;  %v466_v13 = vsel %vm402_vm5, %v308_v46, %v434_v61 }
  0xe9   :  { %v453_v6 = vsel %vm389_vm6, %v243_v55, %v421_v0  ;;  %574 = vadd.xlane.f32.xlu1 %v573_v3  ;;  %526 = vadd.xlane.f32.xlu0 %v525_v4  ;;  %v253_v9 = vadd.f32 %v775_v5, %v1000_v38  ;;  %v247_v11 = vpop.f32.mrb[5].mxu0  ;;  %v327_v12 = vpop.f32.mrb[5].mxu1  ;;  %v420_v14 = vmul.f32 0.2, %v238_v62  ;;  %v436_v15 = vmul.f32 0.2, %v318_v2 }
  0xea   :  { %v492_v10 = vmul.f32 %v1009_v47, %v453_v6  ;;  %v248_v16 = vadd.f32 %v1000_v38, %v247_v11  ;;  %v469_v17 = vsel %vm405_vm7, %v323_v57, %v437_v1  ;;  %vm388_vm8 = vcmp.gt.f32.partialorder %v238_v62, 0.0 }
  0xeb   :  { %v778_v18 = vpop.f32.mrb[6].mxu0  ;;  %vm404_vm9 = vcmp.gt.f32.partialorder %v318_v2, 0.0  ;;  %v522_v22 = vsel %vm521_vm4, %v489_v7, 0.0  ;;  %v333_v23 = vadd.f32 %v799_v8, %v1000_v38  ;;  %v423_v24 = vmul.f32 0.2, %v253_v9 }
  0xec   :  { %v802_v19 = vpop.f32.mrb[6].mxu1  ;;  %v531_v20 = vsel %vm521_vm4, %v492_v10, 0.0  ;;  %v257_v21 = vpop.f32.mrb[7].mxu0  ;;  %v328_v25 = vadd.f32 %v1000_v38, %v327_v12  ;;  %v508_v26 = vmul.f32 %v1009_v47, %v469_v17  ;;  %v505_v27 = vmul.f32 %v1009_v47, %v466_v13 }
  0xed   :  { %532 = vadd.xlane.f32.xlu1 %v531_v20  ;;  %523 = vadd.xlane.f32.xlu0 %v522_v22  ;;  %v337_v28 = vpop.f32.mrb[7].mxu1  ;;  %vm391_vm10 = vcmp.gt.f32.partialorder %v253_v9, 0.0  ;;  %v422_v29 = vmul.f32 0.2, %v248_v16  ;;  %v452_v30 = vsel %vm388_vm8, %v238_v62, %v420_v14  ;;  %v468_v31 = vsel %vm404_vm9, %v318_v2, %v436_v15 }
  0xee   :  { %vm390_vm11 = vcmp.gt.f32.partialorder %v248_v16, 0.0  ;;  %v263_v34 = vadd.f32 %v778_v18, %v1000_v38  ;;  %v579_v36 = vsel %vm521_vm4, %v508_v26, 0.0  ;;  %v570_v37 = vsel %vm521_vm4, %v505_v27, 0.0 }
  0xef   :  { %v781_v32 = vpop.f32.mrb[8].mxu0  ;;  %v491_v39 = vmul.f32 %v1009_v47, %v452_v30  ;;  %v507_v40 = vmul.f32 %v1009_v47, %v468_v31  ;;  %v439_v42 = vmul.f32 0.2, %v333_v23  ;;  %v438_v43 = vmul.f32 0.2, %v328_v25 }
  0xf0   :  { %v805_v33 = vpop.f32.mrb[8].mxu1  ;;  %v267_v35 = vpop.f32.mrb[9].mxu0  ;;  %v258_v44 = vadd.f32 %v1000_v38, %v257_v21  ;;  %v455_v45 = vsel %vm391_vm10, %v253_v9, %v423_v24  ;;  %vm407_vm12 = vcmp.gt.f32.partialorder %v333_v23, 0.0  ;;  %vm406_vm13 = vcmp.gt.f32.partialorder %v328_v25, 0.0 }
  0xf1   :  { %v347_v41 = vpop.f32.mrb[9].mxu1  ;;  %580 = vadd.xlane.f32.xlu1 %v579_v36  ;;  %571 = vadd.xlane.f32.xlu0 %v570_v37  ;;  %v454_v46 = vsel %vm390_vm11, %v248_v16, %v422_v29  ;;  %v425_v50 = vmul.f32 0.2, %v263_v34  ;;  %v343_v51 = vadd.f32 %v802_v19, %v1000_v38  ;;  %v528_v54 = vsel %vm521_vm4, %v491_v39, 0.0 }
  0xf2   :  { %v576_v55 = vsel %vm521_vm4, %v507_v40, 0.0  ;;  %v494_v56 = vmul.f32 %v1009_v47, %v455_v45  ;;  %v493_v57 = vmul.f32 %v1009_v47, %v454_v46  ;;  %v424_v58 = vmul.f32 0.2, %v258_v44 }
  0xf3   :  { %v784_v48 = vpop.f32.mrb[10].mxu0  ;;  %v338_v59 = vadd.f32 %v1000_v38, %v337_v28  ;;  %v471_v60 = vsel %vm407_vm12, %v333_v23, %v439_v42  ;;  %v470_v61 = vsel %vm406_vm13, %v328_v25, %v438_v43  ;;  %vm393_vm14 = vcmp.gt.f32.partialorder %v263_v34, 0.0 }
  0xf4   :  { %v1040_v49 = vpop.f32.mrb[10].mxu1  ;;  %v277_v52 = vpop.f32.mrb[11].mxu0  ;;  %vm392_vm15 = vcmp.gt.f32.partialorder %v258_v44, 0.0  ;;  %v441_v0 = vmul.f32 0.2, %v343_v51  ;;  %v273_v1 = vadd.f32 %v781_v32, %v1000_v38  ;;  %v537_v4 = vsel %vm521_vm4, %v494_v56, 0.0 }
  0xf5   :  { %v1043_v53 = vpop.f32.mrb[11].mxu1  ;;  %529 = vadd.xlane.f32.xlu1 %v528_v54  ;;  %577 = vadd.xlane.f32.xlu0 %v576_v55  ;;  %v534_v5 = vsel %vm521_vm4, %v493_v57, 0.0  ;;  %v510_v6 = vmul.f32 %v1009_v47, %v471_v60  ;;  %v509_v7 = vmul.f32 %v1009_v47, %v470_v61  ;;  %v440_v8 = vmul.f32 0.2, %v338_v59 }
  0xf6   :  { %v268_v9 = vadd.f32 %v1000_v38, %v267_v35  ;;  %v457_v10 = vsel %vm393_vm14, %v263_v34, %v425_v50  ;;  %v456_v11 = vsel %vm392_vm15, %v258_v44, %v424_v58  ;;  %vm409_vm0 = vcmp.gt.f32.partialorder %v343_v51, 0.0 }
  0xf7   :  { %v1052_v62 = vpop.f32.mrb[12].mxu0  ;;  %vm408_vm1 = vcmp.gt.f32.partialorder %v338_v59, 0.0  ;;  %v427_v14 = vmul.f32 0.2, %v273_v1  ;;  %v353_v15 = vadd.f32 %v805_v33, %v1000_v38  ;;  %v585_v18 = vsel %vm521_vm4, %v510_v6, 0.0 }
  0xf8   :  { %v1054_v63 = vpop.f32.mrb[12].mxu1  ;;  %v1057_v2 = vpop.f32.mrb[13].mxu0  ;;  %v582_v19 = vsel %vm521_vm4, %v509_v7, 0.0  ;;  %v496_v20 = vmul.f32 %v1009_v47, %v457_v10  ;;  %v495_v21 = vmul.f32 %v1009_v47, %v456_v11  ;;  %v426_v22 = vmul.f32 0.2, %v268_v9 }
  0xf9   :  { %v1059_v3 = vpop.f32.mrb[13].mxu1  ;;  %538 = vadd.xlane.f32.xlu1 %v537_v4  ;;  %535 = vadd.xlane.f32.xlu0 %v534_v5  ;;  %v348_v23 = vadd.f32 %v1000_v38, %v347_v41  ;;  %v473_v24 = vsel %vm409_vm0, %v343_v51, %v441_v0  ;;  %v472_v25 = vsel %vm408_vm1, %v338_v59, %v440_v8  ;;  %vm395_vm2 = vcmp.gt.f32.partialorder %v273_v1, 0.0 }
  0xfa   :  { %vm394_vm3 = vcmp.gt.f32.partialorder %v268_v9, 0.0  ;;  %v443_v26 = vmul.f32 0.2, %v353_v15  ;;  %v283_v27 = vadd.f32 %v784_v48, %v1000_v38  ;;  %v543_v28 = vsel %vm521_vm4, %v496_v20, 0.0 }
  0xfb   :  { %v1068_v12 = vpop.f32.mrb[14].mxu0  ;;  %v540_v29 = vsel %vm521_vm4, %v495_v21, 0.0  ;;  %v512_v30 = vmul.f32 %v1009_v47, %v473_v24  ;;  %v511_v31 = vmul.f32 %v1009_v47, %v472_v25  ;;  %v442_v32 = vmul.f32 0.2, %v348_v23 }
  0xfc   :  { %v1070_v13 = vpop.f32.mrb[14].mxu1  ;;  %v1073_v16 = vpop.f32.mrb[15].mxu0  ;;  %v278_v33 = vadd.f32 %v1000_v38, %v277_v52  ;;  %v459_v34 = vsel %vm395_vm2, %v273_v1, %v427_v14  ;;  %v458_v35 = vsel %vm394_vm3, %v268_v9, %v426_v22  ;;  %vm411_vm5 = vcmp.gt.f32.partialorder %v353_v15, 0.0 }
  0xfd   :  { %v1075_v17 = vpop.f32.mrb[15].mxu1  ;;  %586 = vadd.xlane.f32.xlu1 %v585_v18  ;;  %583 = vadd.xlane.f32.xlu0 %v582_v19  ;;  %vm410_vm6 = vcmp.gt.f32.partialorder %v348_v23, 0.0  ;;  %v429_v36 = vmul.f32 0.2, %v283_v27  ;;  %v363_v37 = vadd.f32 %v1040_v49, %v1000_v38  ;;  %v591_v39 = vsel %vm521_vm4, %v512_v30, 0.0 }
  0xfe   :  { %v588_v40 = vsel %vm521_vm4, %v511_v31, 0.0  ;;  %v498_v41 = vmul.f32 %v1009_v47, %v459_v34  ;;  %v497_v42 = vmul.f32 %v1009_v47, %v458_v35  ;;  %v428_v43 = vmul.f32 0.2, %v278_v33 }
  0xff   :  { %v358_v44 = vadd.f32 %v1000_v38, %v1043_v53  ;;  %v475_v45 = vsel %vm411_vm5, %v353_v15, %v443_v26  ;;  %v474_v46 = vsel %vm410_vm6, %v348_v23, %v442_v32  ;;  %vm397_vm7 = vcmp.gt.f32.partialorder %v283_v27, 0.0 }
 0x100   :  { %vm396_vm8 = vcmp.gt.f32.partialorder %v278_v33, 0.0  ;;  %v445_v48 = vmul.f32 0.2, %v363_v37  ;;  %v293_v49 = vadd.f32 %v1052_v62, %v1000_v38  ;;  %v549_v50 = vsel %vm521_vm4, %v498_v41, 0.0 }
 0x101   :  { %544 = vadd.xlane.f32.xlu1 %v543_v28  ;;  %541 = vadd.xlane.f32.xlu0 %v540_v29  ;;  %v546_v51 = vsel %vm521_vm4, %v497_v42, 0.0  ;;  %v514_v52 = vmul.f32 %v1009_v47, %v475_v45  ;;  %v513_v54 = vmul.f32 %v1009_v47, %v474_v46  ;;  %v444_v55 = vmul.f32 0.2, %v358_v44 }
 0x102   :  { %v288_v53 = vadd.f32 %v1000_v38, %v1057_v2  ;;  %v461_v56 = vsel %vm397_vm7, %v283_v27, %v429_v36  ;;  %v460_v57 = vsel %vm396_vm8, %v278_v33, %v428_v43  ;;  %vm413_vm9 = vcmp.gt.f32.partialorder %v363_v37, 0.0 }
 0x103   :  { %vm412_vm10 = vcmp.gt.f32.partialorder %v358_v44, 0.0  ;;  %v431_v58 = vmul.f32 0.2, %v293_v49  ;;  %v373_v59 = vadd.f32 %v1054_v63, %v1000_v38  ;;  %v597_v60 = vsel %vm521_vm4, %v514_v52, 0.0 }
 0x104   :  { %v594_v61 = vsel %vm521_vm4, %v513_v54, 0.0  ;;  %v500_v62 = vmul.f32 %v1009_v47, %v461_v56  ;;  %v499_v0 = vmul.f32 %v1009_v47, %v460_v57  ;;  %v430_v1 = vmul.f32 0.2, %v288_v53 }
 0x105   :  { %592 = vadd.xlane.f32.xlu1 %v591_v39  ;;  %589 = vadd.xlane.f32.xlu0 %v588_v40  ;;  %v368_v2 = vadd.f32 %v1000_v38, %v1059_v3  ;;  %v477_v4 = vsel %vm413_vm9, %v363_v37, %v445_v48  ;;  %v476_v5 = vsel %vm412_vm10, %v358_v44, %v444_v55  ;;  %vm399_vm11 = vcmp.gt.f32.partialorder %v293_v49, 0.0 }
 0x106   :  { %vm398_vm12 = vcmp.gt.f32.partialorder %v288_v53, 0.0  ;;  %v447_v6 = vmul.f32 0.2, %v373_v59  ;;  %v303_v63 = vadd.f32 %v1068_v12, %v1000_v38  ;;  %v555_v7 = vsel %vm521_vm4, %v500_v62, 0.0 }
 0x107   :  { %v552_v8 = vsel %vm521_vm4, %v499_v0, 0.0  ;;  %v516_v9 = vmul.f32 %v1009_v47, %v477_v4  ;;  %v515_v10 = vmul.f32 %v1009_v47, %v476_v5  ;;  %v446_v11 = vmul.f32 0.2, %v368_v2 }
 0x108   :  { %v298_v3 = vadd.f32 %v1000_v38, %v1073_v16  ;;  %v463_v14 = vsel %vm399_vm11, %v293_v49, %v431_v58  ;;  %v462_v15 = vsel %vm398_vm12, %v288_v53, %v430_v1  ;;  %vm415_vm13 = vcmp.gt.f32.partialorder %v373_v59, 0.0 }
 0x109   :  { %550 = vadd.xlane.f32.xlu1 %v549_v50  ;;  %547 = vadd.xlane.f32.xlu0 %v546_v51  ;;  %vm414_vm14 = vcmp.gt.f32.partialorder %v368_v2, 0.0  ;;  %v433_v18 = vmul.f32 0.2, %v303_v63  ;;  %v383_v12 = vadd.f32 %v1070_v13, %v1000_v38  ;;  %v603_v19 = vsel %vm521_vm4, %v516_v9, 0.0 }
 0x10a   :  { %v600_v20 = vsel %vm521_vm4, %v515_v10, 0.0  ;;  %v502_v21 = vmul.f32 %v1009_v47, %v463_v14  ;;  %v501_v22 = vmul.f32 %v1009_v47, %v462_v15  ;;  %v432_v23 = vmul.f32 0.2, %v298_v3 }
 0x10b   :  { %v378_v16 = vadd.f32 %v1000_v38, %v1075_v17  ;;  %v479_v24 = vsel %vm415_vm13, %v373_v59, %v447_v6  ;;  %v478_v25 = vsel %vm414_vm14, %v368_v2, %v446_v11  ;;  %vm401_vm15 = vcmp.gt.f32.partialorder %v303_v63, 0.0 }
 0x10c   :  { %vm400_vm0 = vcmp.gt.f32.partialorder %v298_v3, 0.0  ;;  %v561_v13 = vsel %vm521_vm4, %v502_v21, 0.0  ;;  %v558_v26 = vsel %vm521_vm4, %v501_v22, 0.0  ;;  %v518_v27 = vmul.f32 %v1009_v47, %v479_v24 }
 0x10d   :  { %598 = vadd.xlane.f32.xlu1 %v597_v60  ;;  %595 = vadd.xlane.f32.xlu0 %v594_v61  ;;  %v517_v28 = vmul.f32 %v1009_v47, %v478_v25  ;;  %v449_v29 = vmul.f32 0.2, %v383_v12  ;;  %v448_v30 = vmul.f32 0.2, %v378_v16  ;;  %v465_v31 = vsel %vm401_vm15, %v303_v63, %v433_v18 }
 0x10e   :  { %v464_v32 = vsel %vm400_vm0, %v298_v3, %v432_v23  ;;  %vm417_vm1 = vcmp.gt.f32.partialorder %v383_v12, 0.0  ;;  %vm416_vm2 = vcmp.gt.f32.partialorder %v378_v16, 0.0  ;;  %v609_v38 = vsel %vm521_vm4, %v518_v27, 0.0 }
 0x10f   :  { %v606_v17 = vsel %vm521_vm4, %v517_v28, 0.0  ;;  %v504_v33 = vmul.f32 %v1009_v47, %v465_v31  ;;  %v503_v34 = vmul.f32 %v1009_v47, %v464_v32  ;;  %v481_v35 = vsel %vm417_vm1, %v383_v12, %v449_v29 }
 0x110   :  { %v480_v36 = vsel %vm416_vm2, %v378_v16, %v448_v30  ;;  %v520_v40 = vmul.f32 %v1009_v47, %v481_v35  ;;  %v1147_v44 = vstv %s1313_s4  ;;  %vm652_vm3 = vcmask 7168  }
 0x111   :  { %556 = vadd.xlane.f32.xlu1 %v555_v7  ;;  %553 = vadd.xlane.f32.xlu0 %v552_v8  ;;  %v567_v37 = vsel %vm521_vm4, %v504_v33, 0.0  ;;  %v564_v39 = vsel %vm521_vm4, %v503_v34, 0.0  ;;  %v519_v41 = vmul.f32 %v1009_v47, %v480_v36 }
 0x112   :  { %v615_v42 = vsel %vm521_vm4, %v520_v40, 0.0 }
 0x113   :  { %v612_v43 = vsel %vm521_vm4, %v519_v41, 0.0 }
 0x115   :  { %604 = vadd.xlane.f32.xlu1 %v603_v19  ;;  %601 = vadd.xlane.f32.xlu0 %v600_v20 }
 0x119   :  { %562 = vadd.xlane.f32.xlu1 %v561_v13  ;;  %559 = vadd.xlane.f32.xlu0 %v558_v26 }
 0x11d   :  { %610 = vadd.xlane.f32.xlu1 %v609_v38  ;;  %607 = vadd.xlane.f32.xlu0 %v606_v17 }
 0x121   :  { %568 = vadd.xlane.f32.xlu1 %v567_v37  ;;  %565 = vadd.xlane.f32.xlu0 %v564_v39 }
 0x125   :  { %616 = vadd.xlane.f32.xlu1 %v615_v42  ;;  %613 = vadd.xlane.f32.xlu0 %v612_v43 }
 0x176   :  { %v575_v45 = vpop.xlane.xlu1 %574  ;;  %v527_v46 = vpop.xlane.xlu0 %526 }
 0x177   :  { %v637_v48 = vadd.f32 %v1147_v44, %v575_v45  ;;  %v621_v47 = vadd.f32 %v1147_v44, %v527_v46 }
 0x179   :  { %670 = vst.msk [vmem:[%s1314_s5 + $0x88] sm:$0xff] %vm652_vm3, %v637_v48  ;;  %654 = vst.msk [vmem:[%s1314_s5 + $0x8] sm:$0xff] %vm652_vm3, %v621_v47 }
 0x17a   :  { %v533_v49 = vpop.xlane.xlu1 %532  ;;  %v524_v50 = vpop.xlane.xlu0 %523 }
 0x17b   :  { %v623_v51 = vadd.f32 %v1147_v44, %v533_v49  ;;  %v620_v52 = vadd.f32 %v1147_v44, %v524_v50 }
 0x17d   :  { %656 = vst.msk [vmem:[%s1314_s5 + $0x18] sm:$0xff] %vm652_vm3, %v623_v51  ;;  %653 = vst.msk [vmem:[%s1314_s5] sm:$0xff] %vm652_vm3, %v620_v52 }
 0x17e   :  { %v581_v54 = vpop.xlane.xlu1 %580  ;;  %v572_v55 = vpop.xlane.xlu0 %571 }
 0x17f   :  { %v639_v53 = vadd.f32 %v1147_v44, %v581_v54  ;;  %v636_v56 = vadd.f32 %v1147_v44, %v572_v55 }
 0x181   :  { %672 = vst.msk [vmem:[%s1314_s5 + $0x98] sm:$0xff] %vm652_vm3, %v639_v53  ;;  %669 = vst.msk [vmem:[%s1314_s5 + $0x80] sm:$0xff] %vm652_vm3, %v636_v56 }
 0x182   :  { %v530_v57 = vpop.xlane.xlu1 %529  ;;  %v578_v58 = vpop.xlane.xlu0 %577 }
 0x183   :  { %v622_v59 = vadd.f32 %v1147_v44, %v530_v57  ;;  %v638_v60 = vadd.f32 %v1147_v44, %v578_v58 }
 0x185   :  { %655 = vst.msk [vmem:[%s1314_s5 + $0x10] sm:$0xff] %vm652_vm3, %v622_v59  ;;  %671 = vst.msk [vmem:[%s1314_s5 + $0x90] sm:$0xff] %vm652_vm3, %v638_v60 }
 0x186   :  { %v539_v61 = vpop.xlane.xlu1 %538  ;;  %v536_v62 = vpop.xlane.xlu0 %535 }
 0x187   :  { %v625_v0 = vadd.f32 %v1147_v44, %v539_v61  ;;  %v624_v1 = vadd.f32 %v1147_v44, %v536_v62 }
 0x189   :  { %658 = vst.msk [vmem:[%s1314_s5 + $0x28] sm:$0xff] %vm652_vm3, %v625_v0  ;;  %657 = vst.msk [vmem:[%s1314_s5 + $0x20] sm:$0xff] %vm652_vm3, %v624_v1 }
 0x18a   :  { %v587_v2 = vpop.xlane.xlu1 %586  ;;  %v584_v4 = vpop.xlane.xlu0 %583 }
 0x18b   :  { %v641_v5 = vadd.f32 %v1147_v44, %v587_v2  ;;  %v640_v6 = vadd.f32 %v1147_v44, %v584_v4 }
 0x18d   :  { %674 = vst.msk [vmem:[%s1314_s5 + $0xa8] sm:$0xff] %vm652_vm3, %v641_v5  ;;  %673 = vst.msk [vmem:[%s1314_s5 + $0xa0] sm:$0xff] %vm652_vm3, %v640_v6 }
 0x18e   :  { %v545_v63 = vpop.xlane.xlu1 %544  ;;  %v542_v7 = vpop.xlane.xlu0 %541 }
 0x18f   :  { %v627_v8 = vadd.f32 %v1147_v44, %v545_v63  ;;  %v626_v9 = vadd.f32 %v1147_v44, %v542_v7 }
 0x191   :  { %660 = vst.msk [vmem:[%s1314_s5 + $0x38] sm:$0xff] %vm652_vm3, %v627_v8  ;;  %659 = vst.msk [vmem:[%s1314_s5 + $0x30] sm:$0xff] %vm652_vm3, %v626_v9 }
 0x192   :  { %v593_v10 = vpop.xlane.xlu1 %592  ;;  %v590_v11 = vpop.xlane.xlu0 %589 }
 0x193   :  { %v643_v3 = vadd.f32 %v1147_v44, %v593_v10  ;;  %v642_v14 = vadd.f32 %v1147_v44, %v590_v11 }
 0x195   :  { %676 = vst.msk [vmem:[%s1314_s5 + $0xb8] sm:$0xff] %vm652_vm3, %v643_v3  ;;  %675 = vst.msk [vmem:[%s1314_s5 + $0xb0] sm:$0xff] %vm652_vm3, %v642_v14 }
 0x196   :  { %v551_v15 = vpop.xlane.xlu1 %550  ;;  %v548_v18 = vpop.xlane.xlu0 %547 }
 0x197   :  { %v629_v12 = vadd.f32 %v1147_v44, %v551_v15  ;;  %v628_v19 = vadd.f32 %v1147_v44, %v548_v18 }
 0x199   :  { %662 = vst.msk [vmem:[%s1314_s5 + $0x48] sm:$0xff] %vm652_vm3, %v629_v12  ;;  %661 = vst.msk [vmem:[%s1314_s5 + $0x40] sm:$0xff] %vm652_vm3, %v628_v19 }
 0x19a   :  { %v599_v20 = vpop.xlane.xlu1 %598  ;;  %v596_v21 = vpop.xlane.xlu0 %595 }
 0x19b   :  { %v645_v22 = vadd.f32 %v1147_v44, %v599_v20  ;;  %v644_v23 = vadd.f32 %v1147_v44, %v596_v21 }
 0x19d   :  { %678 = vst.msk [vmem:[%s1314_s5 + $0xc8] sm:$0xff] %vm652_vm3, %v645_v22  ;;  %677 = vst.msk [vmem:[%s1314_s5 + $0xc0] sm:$0xff] %vm652_vm3, %v644_v23 }
 0x19e   :  { %v557_v16 = vpop.xlane.xlu1 %556  ;;  %v554_v24 = vpop.xlane.xlu0 %553 }
 0x19f   :  { %v631_v25 = vadd.f32 %v1147_v44, %v557_v16  ;;  %v630_v13 = vadd.f32 %v1147_v44, %v554_v24 }
 0x1a1   :  { %664 = vst.msk [vmem:[%s1314_s5 + $0x58] sm:$0xff] %vm652_vm3, %v631_v25  ;;  %663 = vst.msk [vmem:[%s1314_s5 + $0x50] sm:$0xff] %vm652_vm3, %v630_v13 }
 0x1a2   :  { %v605_v26 = vpop.xlane.xlu1 %604  ;;  %v602_v27 = vpop.xlane.xlu0 %601 }
 0x1a3   :  { %v647_v28 = vadd.f32 %v1147_v44, %v605_v26  ;;  %v646_v29 = vadd.f32 %v1147_v44, %v602_v27 }
 0x1a5   :  { %680 = vst.msk [vmem:[%s1314_s5 + $0xd8] sm:$0xff] %vm652_vm3, %v647_v28  ;;  %679 = vst.msk [vmem:[%s1314_s5 + $0xd0] sm:$0xff] %vm652_vm3, %v646_v29 }
 0x1a6   :  { %v563_v30 = vpop.xlane.xlu1 %562  ;;  %v560_v31 = vpop.xlane.xlu0 %559 }
 0x1a7   :  { %v633_v32 = vadd.f32 %v1147_v44, %v563_v30  ;;  %v632_v38 = vadd.f32 %v1147_v44, %v560_v31 }
 0x1a9   :  { %666 = vst.msk [vmem:[%s1314_s5 + $0x68] sm:$0xff] %vm652_vm3, %v633_v32  ;;  %665 = vst.msk [vmem:[%s1314_s5 + $0x60] sm:$0xff] %vm652_vm3, %v632_v38 }
 0x1aa   :  { %v611_v17 = vpop.xlane.xlu1 %610  ;;  %v608_v33 = vpop.xlane.xlu0 %607 }
 0x1ab   :  { %v649_v34 = vadd.f32 %v1147_v44, %v611_v17  ;;  %v648_v35 = vadd.f32 %v1147_v44, %v608_v33 }
 0x1ad   :  { %682 = vst.msk [vmem:[%s1314_s5 + $0xe8] sm:$0xff] %vm652_vm3, %v649_v34  ;;  %681 = vst.msk [vmem:[%s1314_s5 + $0xe0] sm:$0xff] %vm652_vm3, %v648_v35 }
 0x1ae   :  { %v569_v36 = vpop.xlane.xlu1 %568  ;;  %v566_v37 = vpop.xlane.xlu0 %565 }
 0x1af   :  { %v635_v39 = vadd.f32 %v1147_v44, %v569_v36  ;;  %v634_v40 = vadd.f32 %v1147_v44, %v566_v37 }
 0x1b1   :  { %668 = vst.msk [vmem:[%s1314_s5 + $0x78] sm:$0xff] %vm652_vm3, %v635_v39  ;;  %667 = vst.msk [vmem:[%s1314_s5 + $0x70] sm:$0xff] %vm652_vm3, %v634_v40 }
 0x1b2   :  { %v617_v41 = vpop.xlane.xlu1 %616  ;;  %v614_v42 = vpop.xlane.xlu0 %613 }
 0x1b3   :  { %v651_v43 = vadd.f32 %v1147_v44, %v617_v41  ;;  %v650_v45 = vadd.f32 %v1147_v44, %v614_v42 }
 0x1b5   :  { %684 = vst.msk [vmem:[%s1314_s5 + $0xf8] sm:$0xff] %vm652_vm3, %v651_v43  ;;  %683 = vst.msk [vmem:[%s1314_s5 + $0xf0] sm:$0xff] %vm652_vm3, %v650_v45 }

</bundles_post_ra>
